<compile_context>
chip_gen: v7x
topology: tpu7x:2x2x1
jax: 0.10.0
libtpu: 0.0.40
codegen_flags: <defaults>
</compile_context>

<pallas_src>
import jax
import jax.numpy as jnp
from jax.experimental import pallas as pl
from jax.experimental.pallas import tpu as pltpu


def _get_logist_kernel(patches_ref, w1_ref, shift_ref, w2_ref, b2_ref, out_ref):
    # conv1 (3x3, pad 1) for all 16 pixels at once + folded BatchNorm/bias
    h = jnp.dot(patches_ref[...], w1_ref[...],
                preferred_element_type=jnp.float32)          # (N, 16*C_half)
    h = h + shift_ref[...]
    # LeakyReLU(0.2)
    h = jnp.where(h > 0, h, 0.2 * h)
    # conv2 (4x4, valid) as one K = 16*C_half contraction; single output store
    out_ref[...] = (jnp.dot(h, w2_ref[...], preferred_element_type=jnp.float32)
                    + b2_ref[...])


def init_params(key, input_shape, output_shape):
    c_half = input_shape // 2
    ks = jax.random.split(key, 8)
    w1 = 0.1 * jax.random.normal(ks[0], (c_half, input_shape, 3, 3), jnp.float32)
    b1 = 0.1 * jax.random.normal(ks[1], (c_half,), jnp.float32)
    gamma = 1.0 + 0.1 * jax.random.normal(ks[2], (c_half,), jnp.float32)
    beta = 0.1 * jax.random.normal(ks[3], (c_half,), jnp.float32)
    run_mean = 0.1 * jax.random.normal(ks[4], (c_half,), jnp.float32)
    run_var = jnp.abs(jax.random.normal(ks[5], (c_half,), jnp.float32)) + 0.5
    w2 = 0.1 * jax.random.normal(ks[6], (output_shape, c_half, 4, 4), jnp.float32)
    b2 = 0.1 * jax.random.normal(ks[7], (output_shape,), jnp.float32)
    return dict(w1=w1, b1=b1, gamma=gamma, beta=beta,
                run_mean=run_mean, run_var=run_var, w2=w2, b2=b2)


def get_logist_forward(feature, mean, params):
    # feature: (N, C_f, 4, 4), mean: (N, C_m)  -- matches PyTorch forward
    N, C_f, H, W = feature.shape
    C_m = mean.shape[1]
    C_in = C_f + C_m
    C_half = C_in // 2
    KH = KW = 3
    K1 = C_in * KH * KW
    P = H * W

    # mean.view(-1, C_m, 1, 1).repeat(1, 1, 4, 4) ; cat along channels
    mean_map = jnp.broadcast_to(mean[:, :, None, None], (N, C_m, H, W))
    x = jnp.concatenate([feature, mean_map], axis=1)                    # (N, C_in, 4, 4)

    # im2col for conv1 (3x3, pad 1, stride 1) with a single gather:
    # patches[n, p*K1 + (c*9 + kh*3 + kw)] = x_pad[n, c, i+kh, j+kw],  p = i*W + j
    x_pad = jnp.pad(x, ((0, 0), (0, 0), (1, 1), (1, 1)))
    ii = jnp.arange(H)[:, None] + jnp.arange(KH)[None, :]               # (H, 3)
    jj = jnp.arange(W)[:, None] + jnp.arange(KW)[None, :]               # (W, 3)
    patches = x_pad[:, :, ii[:, None, :, None], jj[None, :, None, :]]   # (N, C_in, H, W, 3, 3)
    patches = jnp.transpose(patches, (0, 2, 3, 1, 4, 5)).reshape(N, P * K1)

    w1, b1, w2, b2 = params["w1"], params["b1"], params["w2"], params["b2"]
    O = w2.shape[0]

    # BatchNorm2d in eval mode folded into conv1 weight + a single per-channel shift.
    # TODO(synk): training-mode BatchNorm (batch statistics) not implemented; eval-mode
    #             running-stats semantics are used.
    eps = 1e-5
    bn_scale = params["gamma"] * jax.lax.rsqrt(params["run_var"] + eps)   # (C_half,)
    w1_mat = w1.reshape(C_half, K1).T * bn_scale[None, :]                 # (K1, C_half)
    shift = (b1 - params["run_mean"]) * bn_scale + params["beta"]         # (C_half,)

    # Block-diagonal conv1 weight: one matmul emits h for all 16 pixels, already laid out
    # as (N, P*C_half) exactly as the conv2 contraction consumes it.
    w1_bd = jnp.einsum("pq,kc->pkqc", jnp.eye(P, dtype=w1_mat.dtype), w1_mat)
    w1_bd = w1_bd.reshape(P * K1, P * C_half)                             # (16*K1, 16*C_half)
    shift_bd = jnp.tile(shift, P).reshape(1, P * C_half)                  # (1, 16*C_half)

    # conv2 (4x4, valid): w2_flat[p*C_half + c, o] = w2[o, c, p // W, p % W]
    w2_flat = jnp.transpose(w2.reshape(O, C_half, P), (2, 1, 0)).reshape(P * C_half, O)
    b2_2d = b2.reshape(1, O)

    out = pl.pallas_call(
        _get_logist_kernel,
        out_shape=jax.ShapeDtypeStruct((N, O), jnp.float32),
        in_specs=[pl.BlockSpec(memory_space=pltpu.MemorySpace.VMEM)] * 5,
        out_specs=pl.BlockSpec(memory_space=pltpu.MemorySpace.VMEM),
    )(patches, w1_bd, shift_bd, w2_flat, b2_2d)

    return out.reshape(N, O, 1, 1)                                       # NCHW, like PyTorch


def reference_forward(feature, mean, params):
    """Pure-JAX reference mirroring the PyTorch module (eval-mode BN)."""
    N, C_f, H, W = feature.shape
    mean_map = jnp.broadcast_to(mean[:, :, None, None], (N, mean.shape[1], H, W))
    x = jnp.concatenate([feature, mean_map], axis=1)
    h = jax.lax.conv_general_dilated(
        x, params["w1"], (1, 1), ((1, 1), (1, 1)),
        dimension_numbers=("NCHW", "OIHW", "NCHW"))
    h = h + params["b1"][None, :, None, None]
    eps = 1e-5
    scale = params["gamma"] / jnp.sqrt(params["run_var"] + eps)
    shift = params["beta"] - params["run_mean"] * scale
    h = h * scale[None, :, None, None] + shift[None, :, None, None]
    h = jnp.where(h > 0, h, 0.2 * h)
    o = jax.lax.conv_general_dilated(
        h, params["w2"], (1, 1), ((0, 0), (0, 0)),
        dimension_numbers=("NCHW", "OIHW", "NCHW"))
    return o + params["b2"][None, :, None, None]


if __name__ == "__main__":
    key = jax.random.PRNGKey(0)
    k_feat, k_mean, k_param = jax.random.split(key, 3)

    N, C_f, C_m, O = 2, 4, 4, 10          # input_shape = C_f + C_m = 8, output_shape = 10
    input_shape = C_f + C_m

    feature = jax.random.normal(k_feat, (N, C_f, 4, 4), jnp.float32)
    mean = jax.random.normal(k_mean, (N, C_m), jnp.float32)
    params = init_params(k_param, input_shape, O)

    out = get_logist_forward(feature, mean, params)
    out = jax.block_until_ready(out)

    ref = reference_forward(feature, mean, params)
    assert out.shape == (N, O, 1, 1), out.shape
    max_err = float(jnp.max(jnp.abs(out - ref)))
    assert max_err < 1e-3, f"max abs error {max_err}"

    print("KERNEL_OK")
</pallas_src>

<mosaic_0001>
module attributes {stable_mosaic.version = 11 : i64} {
  func.func @_get_logist_kernel(%arg0: memref<2x1152xf32, #tpu.memory_space<vmem>>, %arg1: memref<1152x64xf32, #tpu.memory_space<vmem>>, %arg2: memref<1x64xf32, #tpu.memory_space<vmem>>, %arg3: memref<64x10xf32, #tpu.memory_space<vmem>>, %arg4: memref<1x10xf32, #tpu.memory_space<vmem>>, %arg5: memref<2x10xf32, #tpu.memory_space<vmem>>) attributes {dimension_semantics = [], scalar_prefetch = 0 : i64, scratch_operands = 0 : i64, tpu.core_type = #tpu.core_type<tc>} {
    %c0 = arith.constant 0 : index
    %c0_0 = arith.constant 0 : index
    %0 = vector.load %arg0[%c0, %c0_0] : memref<2x1152xf32, #tpu.memory_space<vmem>>, vector<2x1152xf32>
    %c0_1 = arith.constant 0 : index
    %c0_2 = arith.constant 0 : index
    %1 = vector.load %arg1[%c0_1, %c0_2] : memref<1152x64xf32, #tpu.memory_space<vmem>>, vector<1152x64xf32>
    %cst = arith.constant dense<0.000000e+00> : vector<2x64xf32>
    %2 = tpu.matmul %0, %1, %cst {dimension_numbers = #tpu.dot_dimension_numbers<[1], [0], [0], [1], [0, 0, 1, 1], [], []>} : vector<2x1152xf32>, vector<1152x64xf32>, vector<2x64xf32> -> vector<2x64xf32>
    %c0_3 = arith.constant 0 : index
    %c0_4 = arith.constant 0 : index
    %3 = vector.load %arg2[%c0_3, %c0_4] : memref<1x64xf32, #tpu.memory_space<vmem>>, vector<1x64xf32>
    %4 = vector.broadcast %3 : vector<1x64xf32> to vector<2x64xf32>
    %5 = arith.addf %2, %4 : vector<2x64xf32>
    %cst_5 = arith.constant 0.000000e+00 : f32
    %6 = vector.broadcast %cst_5 : f32 to vector<2x64xf32>
    %7 = arith.cmpf ogt, %5, %6 : vector<2x64xf32>
    %cst_6 = arith.constant 2.000000e-01 : f32
    %8 = vector.broadcast %cst_6 : f32 to vector<2x64xf32>
    %9 = arith.mulf %8, %5 : vector<2x64xf32>
    %10 = arith.select %7, %5, %9 : vector<2x64xi1>, vector<2x64xf32>
    %c0_7 = arith.constant 0 : index
    %c0_8 = arith.constant 0 : index
    %11 = vector.load %arg3[%c0_7, %c0_8] : memref<64x10xf32, #tpu.memory_space<vmem>>, vector<64x10xf32>
    %cst_9 = arith.constant dense<0.000000e+00> : vector<2x10xf32>
    %12 = tpu.matmul %10, %11, %cst_9 {dimension_numbers = #tpu.dot_dimension_numbers<[1], [0], [0], [1], [0, 0, 1, 1], [], []>} : vector<2x64xf32>, vector<64x10xf32>, vector<2x10xf32> -> vector<2x10xf32>
    %c0_10 = arith.constant 0 : index
    %c0_11 = arith.constant 0 : index
    %13 = vector.load %arg4[%c0_10, %c0_11] : memref<1x10xf32, #tpu.memory_space<vmem>>, vector<1x10xf32>
    %14 = vector.broadcast %13 : vector<1x10xf32> to vector<2x10xf32>
    %15 = arith.addf %12, %14 : vector<2x10xf32>
    %c0_12 = arith.constant 0 : index
    %c0_13 = arith.constant 0 : index
    %16 = vector.load %arg5[%c0_12, %c0_13] : memref<2x10xf32, #tpu.memory_space<vmem>>, vector<2x10xf32>
    tpu.vector_store %arg5[%c0_12, %c0_13], %15 {strides = array<i32>} : memref<2x10xf32, #tpu.memory_space<vmem>>, vector<2x10xf32>,
    return
  }
}

</mosaic_0001>

<bundles_post_ra>
// kernel: tpu_custom_call.1
= control target key start
LH: loop header
LB: loop body
LE: loop exit
PB: predicated region body
PF: predicated region fallthrough
CT: control target
= control target key end

     0   :  { %v1105_v43 = vmov 1983009808   ;;  %v182_v45 = vlaneseq  ;;  %s1639_s0 = inlined_call_operand.vmem [shape: f32[2,1152], index: 0, kind: input, shape index: {}]   ;;  %s1640_s1 = inlined_call_operand.vmem [shape: f32[1152,64], index: 1, kind: input, shape index: {}]   ;;  %s1641_s2 = inlined_call_operand.vmem [shape: f32[1,64], index: 2, kind: input, shape index: {}]   ;;  %s1642_s3 = inlined_call_operand.vmem [shape: f32[64,10], index: 3, kind: input, shape index: {}]   ;;  %s1643_s4 = inlined_call_operand.vmem [shape: f32[1,10], index: 4, kind: input, shape index: {}]   ;;  %s1644_s5 = inlined_call_operand.hbm [shape: f32[2,10], index: 5, kind: output, shape index: {}]  }
   0x1   :  { %v40_v0 = vld [vmem:[%s1640_s1 + $0x80] sm:$0xff]  ;;  %v41_v1 = vld [vmem:[%s1640_s1 + $0x88] sm:$0xff]  ;;  %v42_v11 = vld [vmem:[%s1640_s1 + $0x90] sm:$0xff]  ;;  %v180_v44 = vunpack.c.l.s4 %v1105_v43 }
   0x2   :  { %v24_v2 = vld [vmem:[%s1640_s1] sm:$0xff]  ;;  %v910_v3 = vpack.c.bf16 %v41_v1, %v40_v0  ;;  %v25_v4 = vld [vmem:[%s1640_s1 + $0x8] sm:$0xff]  ;;  %v43_v13 = vld [vmem:[%s1640_s1 + $0x98] sm:$0xff]  ;;  %v183_v60 = vshrl.u32 %v182_v45, 7 }
   0x3   :  { %v72_v5 = vld [vmem:[%s1640_s1 + $0x180] sm:$0xff]  ;;  %v73_v6 = vld [vmem:[%s1640_s1 + $0x188] sm:$0xff]  ;;  %v912_v7 = vpack.c.bf16 %v25_v4, %v24_v2  ;;  %v26_v14 = vld [vmem:[%s1640_s1 + $0x10] sm:$0xff]  ;;  %v914_v16 = vpack.c.bf16 %v43_v13, %v42_v11  ;;  %v181_v59 = vunpack.c.0.s8 %v180_v44 }
   0x4   :  { %v942_v8 = vpack.c.bf16 %v73_v6, %v72_v5  ;;  %v56_v9 = vld [vmem:[%s1640_s1 + $0x100] sm:$0xff]  ;;  %v57_v10 = vld [vmem:[%s1640_s1 + $0x108] sm:$0xff]  ;;  %911 = vmatprep.subr.bf16.mxu0 %v910_v3  ;;  %v27_v15 = vld [vmem:[%s1640_s1 + $0x18] sm:$0xff] }
   0x5   :  { %v944_v12 = vpack.c.bf16 %v57_v10, %v56_v9  ;;  %913 = vmatpush3.bf16.msra.mxu0 %v912_v7  ;;  %v916_v17 = vpack.c.bf16 %v27_v15, %v26_v14  ;;  %v74_v18 = vld [vmem:[%s1640_s1 + $0x190] sm:$0xff]  ;;  %v75_v19 = vld [vmem:[%s1640_s1 + $0x198] sm:$0xff]  ;;  %v44_v23 = vld [vmem:[%s1640_s1 + $0xa0] sm:$0xff]  ;;  %v1284_v10 = vsub.s32 %v181_v59, %v183_v60 }
   0x6   :  { %943 = vmatprep.subr.bf16.mxu1 %v942_v8  ;;  %v58_v20 = vld [vmem:[%s1640_s1 + $0x110] sm:$0xff]  ;;  %v946_v21 = vpack.c.bf16 %v75_v19, %v74_v18  ;;  %v59_v22 = vld [vmem:[%s1640_s1 + $0x118] sm:$0xff]  ;;  %v45_v24 = vld [vmem:[%s1640_s1 + $0xa8] sm:$0xff]  ;;  %915 = vmatprep.subr.bf16.mxu0 %v914_v16 }
   0x7   :  { %945 = vmatpush3.bf16.msra.mxu1 %v944_v12  ;;  %v948_v25 = vpack.c.bf16 %v59_v22, %v58_v20  ;;  %v918_v26 = vpack.c.bf16 %v45_v24, %v44_v23  ;;  %v28_v27 = vld [vmem:[%s1640_s1 + $0x20] sm:$0xff]  ;;  %v29_v28 = vld [vmem:[%s1640_s1 + $0x28] sm:$0xff]  ;;  %v46_v35 = vld [vmem:[%s1640_s1 + $0xb0] sm:$0xff] }
   0x8   :  { %v76_v29 = vld [vmem:[%s1640_s1 + $0x1a0] sm:$0xff]  ;;  %947 = vmatprep.subr.bf16.mxu1 %v946_v21  ;;  %v77_v30 = vld [vmem:[%s1640_s1 + $0x1a8] sm:$0xff]  ;;  %v920_v33 = vpack.c.bf16 %v29_v28, %v28_v27  ;;  %v47_v36 = vld [vmem:[%s1640_s1 + $0xb8] sm:$0xff] }
   0x9   :  { %v60_v31 = vld [vmem:[%s1640_s1 + $0x120] sm:$0xff]  ;;  %v61_v32 = vld [vmem:[%s1640_s1 + $0x128] sm:$0xff]  ;;  %917 = vmatpush3.bf16.msra.mxu0 %v916_v17  ;;  %v950_v34 = vpack.c.bf16 %v77_v30, %v76_v29  ;;  %v30_v37 = vld [vmem:[%s1640_s1 + $0x30] sm:$0xff]  ;;  %v922_v39 = vpack.c.bf16 %v47_v36, %v46_v35 }
   0xa   :  { %919 = vmatprep.subr.bf16.mxu0 %v918_v26  ;;  %v952_v38 = vpack.c.bf16 %v61_v32, %v60_v31  ;;  %v31_v40 = vld [vmem:[%s1640_s1 + $0x38] sm:$0xff]  ;;  %v78_v41 = vld [vmem:[%s1640_s1 + $0x1b0] sm:$0xff]  ;;  %v48_v49 = vld [vmem:[%s1640_s1 + $0xc0] sm:$0xff] }
   0xb   :  { %949 = vmatpush3.bf16.msra.mxu1 %v948_v25  ;;  %v79_v42 = vld [vmem:[%s1640_s1 + $0x1b8] sm:$0xff]  ;;  %v62_v47 = vld [vmem:[%s1640_s1 + $0x130] sm:$0xff]  ;;  %v49_v50 = vld [vmem:[%s1640_s1 + $0xc8] sm:$0xff]  ;;  %v924_v51 = vpack.c.bf16 %v31_v40, %v30_v37 }
   0xc   :  { %951 = vmatprep.subr.bf16.mxu1 %v950_v34  ;;  %v954_v46 = vpack.c.bf16 %v79_v42, %v78_v41  ;;  %v63_v48 = vld [vmem:[%s1640_s1 + $0x138] sm:$0xff]  ;;  %v80_v52 = vld [vmem:[%s1640_s1 + $0x1c0] sm:$0xff]  ;;  %v81_v53 = vld [vmem:[%s1640_s1 + $0x1c8] sm:$0xff]  ;;  %v926_v55 = vpack.c.bf16 %v49_v50, %v48_v49 }
   0xd   :  { %921 = vmatpush3.bf16.msra.mxu0 %v920_v33  ;;  %v956_v54 = vpack.c.bf16 %v63_v48, %v62_v47  ;;  %v32_v56 = vld [vmem:[%s1640_s1 + $0x40] sm:$0xff]  ;;  %v33_v57 = vld [vmem:[%s1640_s1 + $0x48] sm:$0xff]  ;;  %v958_v61 = vpack.c.bf16 %v81_v53, %v80_v52  ;;  %v50_v63 = vld [vmem:[%s1640_s1 + $0xd0] sm:$0xff] }
   0xe   :  { %923 = vmatprep.subr.bf16.mxu0 %v922_v39  ;;  %v64_v58 = vld [vmem:[%s1640_s1 + $0x140] sm:$0xff]  ;;  %v65_v62 = vld [vmem:[%s1640_s1 + $0x148] sm:$0xff]  ;;  %v51_v0 = vld [vmem:[%s1640_s1 + $0xd8] sm:$0xff]  ;;  %v928_v3 = vpack.c.bf16 %v33_v57, %v32_v56 }
   0xf   :  { %953 = vmatpush3.bf16.msra.mxu1 %v952_v38  ;;  %v82_v1 = vld [vmem:[%s1640_s1 + $0x1d0] sm:$0xff]  ;;  %v83_v2 = vld [vmem:[%s1640_s1 + $0x1d8] sm:$0xff]  ;;  %v960_v5 = vpack.c.bf16 %v65_v62, %v64_v58  ;;  %v930_v6 = vpack.c.bf16 %v51_v0, %v50_v63  ;;  %v52_v12 = vld [vmem:[%s1640_s1 + $0xe0] sm:$0xff] }
  0x10   :  { %955 = vmatprep.subr.bf16.mxu1 %v954_v46  ;;  %v34_v4 = vld [vmem:[%s1640_s1 + $0x50] sm:$0xff]  ;;  %v35_v7 = vld [vmem:[%s1640_s1 + $0x58] sm:$0xff]  ;;  %v962_v11 = vpack.c.bf16 %v83_v2, %v82_v1  ;;  %v53_v13 = vld [vmem:[%s1640_s1 + $0xe8] sm:$0xff] }
  0x11   :  { %925 = vmatpush3.bf16.msra.mxu0 %v924_v51  ;;  %v66_v8 = vld [vmem:[%s1640_s1 + $0x150] sm:$0xff]  ;;  %v67_v9 = vld [vmem:[%s1640_s1 + $0x158] sm:$0xff]  ;;  %v84_v14 = vld [vmem:[%s1640_s1 + $0x1e0] sm:$0xff]  ;;  %v932_v16 = vpack.c.bf16 %v35_v7, %v34_v4  ;;  %v934_v19 = vpack.c.bf16 %v53_v13, %v52_v12 }
  0x12   :  { %927 = vmatprep.subr.bf16.mxu0 %v926_v55  ;;  %v85_v15 = vld [vmem:[%s1640_s1 + $0x1e8] sm:$0xff]  ;;  %v964_v17 = vpack.c.bf16 %v67_v9, %v66_v8  ;;  %v21_v18 = vld [vmem:[%s1639_s0] sm:$0xff]  ;;  %v54_v27 = vld [vmem:[%s1640_s1 + $0xf0] sm:$0xff] }
  0x13   :  { %957 = vmatpush3.bf16.msra.mxu1 %v956_v54  ;;  %v36_v20 = vld [vmem:[%s1640_s1 + $0x60] sm:$0xff]  ;;  %v37_v21 = vld [vmem:[%s1640_s1 + $0x68] sm:$0xff]  ;;  %v185_v23 = vrot.slane %v21_v18, %v1284_v10  ;;  %v178_v24 = vcombine.high %v21_v18, %v21_v18  ;;  %v966_v25 = vpack.c.bf16 %v85_v15, %v84_v14  ;;  %v55_v28 = vld [vmem:[%s1640_s1 + $0xf8] sm:$0xff] }
  0x14   :  { %959 = vmatprep.subr.bf16.mxu1 %v958_v61  ;;  %v68_v22 = vld [vmem:[%s1640_s1 + $0x160] sm:$0xff]  ;;  %v69_v26 = vld [vmem:[%s1640_s1 + $0x168] sm:$0xff]  ;;  %v86_v29 = vld [vmem:[%s1640_s1 + $0x1f0] sm:$0xff]  ;;  %v936_v33 = vpack.c.bf16 %v37_v21, %v36_v20  ;;  %v938_v35 = vpack.c.bf16 %v55_v28, %v54_v27 }
  0x15   :  { %929 = vmatpush3.bf16.msra.mxu0 %v928_v3  ;;  %v87_v30 = vld [vmem:[%s1640_s1 + $0x1f8] sm:$0xff]  ;;  %v193_v31 = vcombine.high %v185_v23, %v185_v23  ;;  %v192_v32 = vrot.slane %v178_v24, %v1284_v10  ;;  %v968_v34 = vpack.c.bf16 %v69_v26, %v68_v22  ;;  %v38_v36 = vld [vmem:[%s1640_s1 + $0x70] sm:$0xff]  ;;  %v104_v42 = vld [vmem:[%s1640_s1 + $0x280] sm:$0xff] }
  0x16   :  { %931 = vmatprep.subr.bf16.mxu0 %v930_v6  ;;  %v39_v37 = vld [vmem:[%s1640_s1 + $0x78] sm:$0xff]  ;;  %v70_v38 = vld [vmem:[%s1640_s1 + $0x170] sm:$0xff]  ;;  %v970_v40 = vpack.c.bf16 %v87_v30, %v86_v29  ;;  %v105_v43 = vld [vmem:[%s1640_s1 + $0x288] sm:$0xff] }
  0x17   :  { %961 = vmatpush3.bf16.msra.mxu1 %v960_v5  ;;  %v194_v39 = vcombine.high %v192_v32, %v192_v32  ;;  %292 = vmatprep.mubr.f32.mxu0 %v193_v31  ;;  %v71_v41 = vld [vmem:[%s1640_s1 + $0x178] sm:$0xff]  ;;  %v136_v44 = vld [vmem:[%s1640_s1 + $0x380] sm:$0xff]  ;;  %v137_v45 = vld [vmem:[%s1640_s1 + $0x388] sm:$0xff]  ;;  %v940_v46 = vpack.c.bf16 %v39_v37, %v38_v36  ;;  %v974_v48 = vpack.c.bf16 %v105_v43, %v104_v42 }
  0x18   :  { %963 = vmatprep.subr.bf16.mxu1 %v962_v11  ;;  %v972_v47 = vpack.c.bf16 %v71_v41, %v70_v38  ;;  %v88_v49 = vld [vmem:[%s1640_s1 + $0x200] sm:$0xff]  ;;  %v89_v50 = vld [vmem:[%s1640_s1 + $0x208] sm:$0xff]  ;;  %v1006_v52 = vpack.c.bf16 %v137_v45, %v136_v44  ;;  %v106_v54 = vld [vmem:[%s1640_s1 + $0x290] sm:$0xff] }
  0x19   :  { %933 = vmatpush3.bf16.msra.mxu0 %v932_v16  ;;  %362 = vmatprep.mubr.f32.mxu1 %v194_v39  ;;  %v120_v51 = vld [vmem:[%s1640_s1 + $0x300] sm:$0xff]  ;;  %v121_v53 = vld [vmem:[%s1640_s1 + $0x308] sm:$0xff]  ;;  %v107_v55 = vld [vmem:[%s1640_s1 + $0x298] sm:$0xff]  ;;  %v976_v58 = vpack.c.bf16 %v89_v50, %v88_v49 }
  0x1a   :  { %935 = vmatprep.subr.bf16.mxu0 %v934_v19  ;;  %v138_v56 = vld [vmem:[%s1640_s1 + $0x390] sm:$0xff]  ;;  %v139_v57 = vld [vmem:[%s1640_s1 + $0x398] sm:$0xff]  ;;  %v1008_v59 = vpack.c.bf16 %v121_v53, %v120_v51  ;;  %v978_v60 = vpack.c.bf16 %v107_v55, %v106_v54  ;;  %v108_v2 = vld [vmem:[%s1640_s1 + $0x2a0] sm:$0xff] }
  0x1b   :  { %965 = vmatpush3.bf16.msra.mxu1 %v964_v17  ;;  %v90_v61 = vld [vmem:[%s1640_s1 + $0x210] sm:$0xff]  ;;  %v91_v62 = vld [vmem:[%s1640_s1 + $0x218] sm:$0xff]  ;;  %v1010_v0 = vpack.c.bf16 %v139_v57, %v138_v56  ;;  %v109_v3 = vld [vmem:[%s1640_s1 + $0x2a8] sm:$0xff] }
  0x1c   :  { %967 = vmatprep.subr.bf16.mxu1 %v966_v25  ;;  %v122_v63 = vld [vmem:[%s1640_s1 + $0x310] sm:$0xff]  ;;  %v123_v1 = vld [vmem:[%s1640_s1 + $0x318] sm:$0xff]  ;;  %v140_v4 = vld [vmem:[%s1640_s1 + $0x3a0] sm:$0xff]  ;;  %v980_v6 = vpack.c.bf16 %v91_v62, %v90_v61  ;;  %v982_v8 = vpack.c.bf16 %v109_v3, %v108_v2 }
  0x1d   :  { %937 = vmatpush3.bf16.msra.mxu0 %v936_v33  ;;  %v141_v5 = vld [vmem:[%s1640_s1 + $0x3a8] sm:$0xff]  ;;  %v1012_v7 = vpack.c.bf16 %v123_v1, %v122_v63  ;;  %v92_v9 = vld [vmem:[%s1640_s1 + $0x220] sm:$0xff]  ;;  %v110_v15 = vld [vmem:[%s1640_s1 + $0x2b0] sm:$0xff] }
  0x1e   :  { %939 = vmatprep.subr.bf16.mxu0 %v938_v35  ;;  %v93_v11 = vld [vmem:[%s1640_s1 + $0x228] sm:$0xff]  ;;  %v124_v12 = vld [vmem:[%s1640_s1 + $0x320] sm:$0xff]  ;;  %v1014_v13 = vpack.c.bf16 %v141_v5, %v140_v4  ;;  %v111_v16 = vld [vmem:[%s1640_s1 + $0x2b8] sm:$0xff] }
  0x1f   :  { %969 = vmatpush3.bf16.msra.mxu1 %v968_v34  ;;  %v125_v14 = vld [vmem:[%s1640_s1 + $0x328] sm:$0xff]  ;;  %v142_v17 = vld [vmem:[%s1640_s1 + $0x3b0] sm:$0xff]  ;;  %v143_v18 = vld [vmem:[%s1640_s1 + $0x3b8] sm:$0xff]  ;;  %v984_v19 = vpack.c.bf16 %v93_v11, %v92_v9  ;;  %v986_v22 = vpack.c.bf16 %v111_v16, %v110_v15 }
  0x20   :  { %971 = vmatprep.subr.bf16.mxu1 %v970_v40  ;;  %v94_v20 = vld [vmem:[%s1640_s1 + $0x230] sm:$0xff]  ;;  %v1016_v21 = vpack.c.bf16 %v125_v14, %v124_v12  ;;  %v127_v25 = vld [vmem:[%s1640_s1 + $0x338] sm:$0xff]  ;;  %v1018_v26 = vpack.c.bf16 %v143_v18, %v142_v17  ;;  %v112_v27 = vld [vmem:[%s1640_s1 + $0x2c0] sm:$0xff] }
  0x21   :  { %941 = vmatpush3.bf16.msra.mxu0 %v940_v46  ;;  %v126_v24 = vld [vmem:[%s1640_s1 + $0x330] sm:$0xff]  ;;  %v113_v28 = vld [vmem:[%s1640_s1 + $0x2c8] sm:$0xff]  ;;  %v144_v30 = vld [vmem:[%s1640_s1 + $0x3c0] sm:$0xff] }
  0x22   :  { %975 = vmatprep.subr.bf16.mxu0 %v974_v48  ;;  %v22_v29 = vld [vmem:[%s1639_s0 + $0x8] sm:$0xff]  ;;  %v1020_v35 = vpack.c.bf16 %v127_v25, %v126_v24  ;;  %v990_v36 = vpack.c.bf16 %v113_v28, %v112_v27  ;;  %v96_v37 = vld [vmem:[%s1640_s1 + $0x240] sm:$0xff]  ;;  %v114_v44 = vld [vmem:[%s1640_s1 + $0x2d0] sm:$0xff] }
  0x23   :  { %973 = vmatpush3.bf16.msra.mxu1 %v972_v47  ;;  %v145_v31 = vld [vmem:[%s1640_s1 + $0x3c8] sm:$0xff]  ;;  %v195_v33 = vcombine.high %v22_v29, %v22_v29  ;;  %v128_v39 = vld [vmem:[%s1640_s1 + $0x340] sm:$0xff]  ;;  %v115_v45 = vld [vmem:[%s1640_s1 + $0x2d8] sm:$0xff] }
  0x24   :  { %1007 = vmatprep.subr.bf16.mxu1 %v1006_v52  ;;  %293 = vmatmul.mubr.f32.vlgmr.msra.gmra.mrb[0].mxu0 %v185_v23  ;;  %v95_v23 = vld [vmem:[%s1640_s1 + $0x238] sm:$0xff]  ;;  %v97_v38 = vld [vmem:[%s1640_s1 + $0x248] sm:$0xff]  ;;  %v1022_v42 = vpack.c.bf16 %v145_v31, %v144_v30  ;;  %v146_v46 = vld [vmem:[%s1640_s1 + $0x3d0] sm:$0xff]  ;;  %v994_v51 = vpack.c.bf16 %v115_v45, %v114_v44 }
  0x25   :  { %977 = vmatpush3.bf16.msra.mxu0 %v976_v58  ;;  %v988_v34 = vpack.c.bf16 %v95_v23, %v94_v20  ;;  %v1465_v41 = vrot.slane %v195_v33, %v1284_v10  ;;  %v129_v43 = vld [vmem:[%s1640_s1 + $0x348] sm:$0xff]  ;;  %v992_v48 = vpack.c.bf16 %v97_v38, %v96_v37  ;;  %v98_v49 = vld [vmem:[%s1640_s1 + $0x250] sm:$0xff]  ;;  %v99_v52 = vld [vmem:[%s1640_s1 + $0x258] sm:$0xff] }
  0x26   :  { %363 = vmatmul.mubr.f32.vlgmr.msra.gmra.mrb[0].mxu1 %v192_v32  ;;  %979 = vmatprep.subr.bf16.mxu0 %v978_v60  ;;  %v1451_v32 = vrot.slane %v22_v29, %v1284_v10  ;;  %v147_v10 = vld [vmem:[%s1640_s1 + $0x3d8] sm:$0xff]  ;;  %v1024_v50 = vpack.c.bf16 %v129_v43, %v128_v39  ;;  %v130_v53 = vld [vmem:[%s1640_s1 + $0x350] sm:$0xff] }
  0x27   :  { %1009 = vmatpush3.bf16.msra.mxu1 %v1008_v59  ;;  %v211_v47 = vcombine.high %v1465_v41, %v1465_v41 }
  0x28   :  { %1011 = vmatprep.subr.bf16.mxu1 %v1010_v0  ;;  %v210_v40 = vcombine.high %v1451_v32, %v1451_v32 }
  0x29   :  { %981 = vmatpush3.bf16.msra.mxu0 %v980_v6 }
  0x2a   :  { %983 = vmatprep.subr.bf16.mxu0 %v982_v8  ;;  %432 = vmatprep.mubr.f32.mxu0 %v210_v40 }
  0x2b   :  { %1013 = vmatpush3.bf16.msra.mxu1 %v1012_v7 }
  0x2c   :  { %1015 = vmatprep.subr.bf16.mxu1 %v1014_v13 }
  0x2d   :  { %985 = vmatpush3.bf16.msra.mxu0 %v984_v19 }
  0x2e   :  { %987 = vmatprep.subr.bf16.mxu0 %v986_v22 }
  0x2f   :  { %1017 = vmatpush3.bf16.msra.mxu1 %v1016_v21 }
  0x30   :  { %1019 = vmatprep.subr.bf16.mxu1 %v1018_v26 }
  0x31   :  { %989 = vmatpush3.bf16.msra.mxu0 %v988_v34 }
  0x32   :  { %991 = vmatprep.subr.bf16.mxu0 %v990_v36 }
  0x33   :  { %1021 = vmatpush3.bf16.msra.mxu1 %v1020_v35 }
  0x34   :  { %10 = vsyncpa [#allocation3], 0  ;;  %1023 = vmatprep.subr.bf16.mxu1 %v1022_v42  ;;  %v1026_v54 = vpack.c.bf16 %v147_v10, %v146_v46  ;;  %v131_v55 = vld [vmem:[%s1640_s1 + $0x358] sm:$0xff]  ;;  %v116_v56 = vld [vmem:[%s1640_s1 + $0x2e0] sm:$0xff]  ;;  %502 = vmatprep.mubr.f32.mxu1 %v211_v47  ;;  %v996_v60 = vpack.c.bf16 %v99_v52, %v98_v49  ;;  %v1106_v22 = vmov 0.0|0.0   ;;  %vm1107_vm0 = vmmov 0  }
  0x35   :  { %v117_v57 = vld [vmem:[%s1640_s1 + $0x2e8] sm:$0xff]  ;;  %v148_v58 = vld [vmem:[%s1640_s1 + $0x3e0] sm:$0xff]  ;;  %993 = vmatpush3.bf16.msra.mxu0 %v992_v48  ;;  %v1028_v61 = vpack.c.bf16 %v131_v55, %v130_v53  ;;  %v118_v4 = vld [vmem:[%s1640_s1 + $0x2f0] sm:$0xff]  ;;  %v1108_v28 = vmov 0.0   ;;  %vm596_vm2 = vcmask 523264   ;;  %s1109_s28 = smov [#allocation2]  }
  0x36   :  { %v149_v59 = vld [vmem:[%s1640_s1 + $0x3e8] sm:$0xff]  ;;  %995 = vmatprep.subr.bf16.mxu0 %v994_v51  ;;  %v998_v62 = vpack.c.bf16 %v117_v57, %v116_v56  ;;  %v100_v63 = vld [vmem:[%s1640_s1 + $0x260] sm:$0xff]  ;;  %v119_v5 = vld [vmem:[%s1640_s1 + $0x2f8] sm:$0xff]  ;;  %s678_s29 = sshll.u32 %s1109_s28, 4  ;;  %vm670_vm3 = vcmask 74752   ;;  %s679_s29 = int_to_ptr.vmem [resolvable:$true] %s678_s29 }
  0x37   :  { %1025 = vmatpush3.bf16.msra.mxu1 %v1024_v50  ;;  %v101_v0 = vld [vmem:[%s1640_s1 + $0x268] sm:$0xff]  ;;  %v132_v1 = vld [vmem:[%s1640_s1 + $0x360] sm:$0xff]  ;;  %v1030_v2 = vpack.c.bf16 %v149_v59, %v148_v58  ;;  %v150_v6 = vld [vmem:[%s1640_s1 + $0x3f0] sm:$0xff]  ;;  %v1002_v11 = vpack.c.bf16 %v119_v5, %v118_v4  ;;  %s1081_s30 = scalar_lea.vmem %s679_s29, 32  ;;  %p1086_p1 = scmp.lt.s32.totalorder %s679_s29, %s679_s29 }
  0x38   :  { %1027 = vmatprep.subr.bf16.mxu1 %v1026_v54  ;;  %v133_v3 = vld [vmem:[%s1640_s1 + $0x368] sm:$0xff]  ;;  %v151_v7 = vld [vmem:[%s1640_s1 + $0x3f8] sm:$0xff]  ;;  %v1000_v8 = vpack.c.bf16 %v101_v0, %v100_v63  ;;  %v102_v12 = vld [vmem:[%s1640_s1 + $0x270] sm:$0xff]  ;;  %p1082_p0 = scmp.ne.s32.totalorder %s679_s29, %s1081_s30  ;;  %p1087_p2 = scmp.lt.s32.totalorder %s1081_s30, %s1081_s30 }
  0x39   :  { %997 = vmatpush3.bf16.msra.mxu0 %v996_v60  ;;  %v1032_v9 = vpack.c.bf16 %v133_v3, %v132_v1  ;;  %v103_v13 = vld [vmem:[%s1640_s1 + $0x278] sm:$0xff]  ;;  %v1034_v14 = vpack.c.bf16 %v151_v7, %v150_v6  ;;  %v134_v15 = vld [vmem:[%s1640_s1 + $0x370] sm:$0xff]  ;;  %v152_v19 = vld [vmem:[%s1640_s1 + $0x400] sm:$0xff] }
  0x3a   :  { %999 = vmatprep.subr.bf16.mxu0 %v998_v62  ;;  %v135_v16 = vld [vmem:[%s1640_s1 + $0x378] sm:$0xff]  ;;  %v1004_v17 = vpack.c.bf16 %v103_v13, %v102_v12  ;;  %v153_v20 = vld [vmem:[%s1640_s1 + $0x408] sm:$0xff]  ;;  %v154_v23 = vld [vmem:[%s1640_s1 + $0x410] sm:$0xff]  ;;  %p1088_p3 = por %p1087_p2, %p1086_p1 }
  0x3b   :  { %1029 = vmatpush3.bf16.msra.mxu1 %v1028_v61  ;;  %v1036_v18 = vpack.c.bf16 %v135_v16, %v134_v15  ;;  %v1039_v21 = vpack.c.bf16 %v153_v20, %v152_v19  ;;  %v155_v24 = vld [vmem:[%s1640_s1 + $0x418] sm:$0xff]  ;;  %v156_v26 = vld [vmem:[%s1640_s1 + $0x420] sm:$0xff]  ;;  %v157_v27 = vld [vmem:[%s1640_s1 + $0x428] sm:$0xff] }
  0x3c   :  { %1031 = vmatprep.subr.bf16.mxu1 %v1030_v2  ;;  %v1042_v25 = vpack.c.bf16 %v155_v24, %v154_v23  ;;  %v1045_v29 = vpack.c.bf16 %v157_v27, %v156_v26  ;;  %v158_v30 = vld [vmem:[%s1640_s1 + $0x430] sm:$0xff]  ;;  %v159_v31 = vld [vmem:[%s1640_s1 + $0x438] sm:$0xff]  ;;  %v160_v33 = vld [vmem:[%s1640_s1 + $0x440] sm:$0xff]  ;;  %p1089_p4 = pnand %p1088_p3, %p1082_p0 }
  0x3d   :  { %1001 = vmatpush3.bf16.msra.mxu0 %v1000_v8  ;;  %v161_v34 = vld [vmem:[%s1640_s1 + $0x448] sm:$0xff]  ;;  %v162_v36 = vld [vmem:[%s1640_s1 + $0x450] sm:$0xff]  ;;  %v163_v37 = vld [vmem:[%s1640_s1 + $0x458] sm:$0xff] }
  0x3e   :  { %1003 = vmatprep.subr.bf16.mxu0 %v1002_v11  ;;  %v1051_v35 = vpack.c.bf16 %v161_v34, %v160_v33  ;;  %v1054_v38 = vpack.c.bf16 %v163_v37, %v162_v36  ;;  %v164_v39 = vld [vmem:[%s1640_s1 + $0x460] sm:$0xff]  ;;  %v165_v40 = vld [vmem:[%s1640_s1 + $0x468] sm:$0xff]  ;;  %v166_v42 = vld [vmem:[%s1640_s1 + $0x470] sm:$0xff] }
  0x3f   :  { %1033 = vmatpush3.bf16.msra.mxu1 %v1032_v9  ;;  %v167_v43 = vld [vmem:[%s1640_s1 + $0x478] sm:$0xff]  ;;  %v687_v45 = vld.sshfl [vmem:[%s1639_s0 + $0x10] sm:$0x3 pattern:$0x76325410]  ;;  %v581_v46 = vld [vmem:[%s1642_s3] sm:$0xff] }
  0x40   :  { %1035 = vmatprep.subr.bf16.mxu1 %v1034_v14  ;;  %v1060_v44 = vpack.c.bf16 %v167_v43, %v166_v42  ;;  %v582_v10 = vld [vmem:[%s1642_s3 + $0x8] sm:$0xff]  ;;  %v583_v47 = vld [vmem:[%s1642_s3 + $0x10] sm:$0xff]  ;;  %v584_v49 = vld [vmem:[%s1642_s3 + $0x18] sm:$0xff] }
  0x41   :  { %1005 = vmatpush3.bf16.msra.mxu0 %v1004_v17  ;;  %v1063_v48 = vpack.c.bf16 %v582_v10, %v581_v46  ;;  %v1066_v50 = vpack.c.bf16 %v584_v49, %v583_v47  ;;  %v585_v51 = vld [vmem:[%s1642_s3 + $0x20] sm:$0xff]  ;;  %v586_v52 = vld [vmem:[%s1642_s3 + $0x28] sm:$0xff]  ;;  %v587_v54 = vld [vmem:[%s1642_s3 + $0x30] sm:$0xff] }
  0x42   :  { %1038 = vmatprep.subr.bf16.mxu0 %v1106_v22  ;;  %v1069_v53 = vpack.c.bf16 %v586_v52, %v585_v51  ;;  %v588_v55 = vld [vmem:[%s1642_s3 + $0x38] sm:$0xff]  ;;  %v686_v58 = vld [vmem:[%s1641_s2] ss:$0 sm:$0xff] }
  0x43   :  { %1037 = vmatpush3.bf16.msra.mxu1 %v1036_v18  ;;  %v1072_v56 = vpack.c.bf16 %v588_v55, %v587_v54  ;;  %v688_v16 = vld [vmem:[%s1643_s4] ss:$0 sm:$0xff] }
  0x44   :  { %1062 = vmatprep.subr.bf16.mxu1 %v1106_v22  ;;  %433 = vmatmul.mubr.f32.vlgmr.msra.gmra.mrb[2].mxu0 %v1451_v32  ;;  %v1048_v32 = vpack.c.bf16 %v159_v31, %v158_v30 }
  0x45   :  { %1040 = vmatpush3.bf16.msra.mxu0 %v1039_v21  ;;  %888 = vmatprep.mubr.msk.f32.mxu0 %vm1107_vm0, %v1108_v28 }
  0x46   :  { %503 = vmatmul.mubr.f32.vlgmr.msra.gmra.mrb[2].mxu1 %v1465_v41  ;;  %1041 = vmatprep.subr.bf16.mxu0 %v1106_v22  ;;  %v1057_v41 = vpack.c.bf16 %v165_v40, %v164_v39 }
  0x47   :  { %907 = vmatprep.mubr.msk.f32.mxu1 %vm1107_vm0, %v1108_v28  ;;  %1064 = vmatpush3.bf16.msra.mxu1 %v1063_v48 }
  0x48   :  { %1065 = vmatprep.subr.bf16.mxu1 %v1106_v22 }
  0x49   :  { %1043 = vmatpush3.bf16.msra.mxu0 %v1042_v25 }
  0x4a   :  { %1044 = vmatprep.subr.bf16.mxu0 %v1106_v22 }
  0x4b   :  { %1067 = vmatpush3.bf16.msra.mxu1 %v1066_v50 }
  0x4c   :  { %1068 = vmatprep.subr.bf16.mxu1 %v1106_v22 }
  0x4d   :  { %1046 = vmatpush3.bf16.msra.mxu0 %v1045_v29 }
  0x4e   :  { %1047 = vmatprep.subr.bf16.mxu0 %v1106_v22 }
  0x4f   :  { %1070 = vmatpush3.bf16.msra.mxu1 %v1069_v53 }
  0x50   :  { %1071 = vmatprep.subr.bf16.mxu1 %v1106_v22 }
  0x51   :  { %1049 = vmatpush3.bf16.msra.mxu0 %v1048_v32 }
  0x52   :  { %1050 = vmatprep.subr.bf16.mxu0 %v1106_v22 }
  0x53   :  { %1073 = vmatpush3.bf16.msra.mxu1 %v1072_v56 }
  0x55   :  { %1052 = vmatpush3.bf16.msra.mxu0 %v1051_v35 }
  0x56   :  { %1053 = vmatprep.subr.bf16.mxu0 %v1106_v22 }
  0x59   :  { %1055 = vmatpush3.bf16.msra.mxu0 %v1054_v38 }
  0x5a   :  { %1056 = vmatprep.subr.bf16.mxu0 %v1106_v22 }
  0x5d   :  { %1058 = vmatpush3.bf16.msra.mxu0 %v1057_v41 }
  0x5e   :  { %1059 = vmatprep.subr.bf16.mxu0 %v1106_v22 }
  0x61   :  { %1061 = vmatpush3.bf16.msra.mxu0 %v1060_v44 }
  0x64   :  { %889 = vmatmul.mubr.f32.vlgmr.msra.gmra.mrb[4].mxu0 %v687_v45 }
  0xf7   :  { %v722_v57 = vpop.f32.mrb[0].mxu0 }
  0xf8   :  { %v723_v59 = vpop.f32.mrb[1].mxu0 }
  0xf9   :  { %v757_v60 = vpop.f32.mrb[0].mxu1  ;;  %v724_v61 = vadd.f32 %v723_v59, %v722_v57 }
  0xfa   :  { %v758_v62 = vpop.f32.mrb[1].mxu1 }
  0xfb   :  { %v759_v63 = vadd.f32 %v758_v62, %v757_v60  ;;  %v295_v0 = vadd.f32 %v724_v61, %v686_v58 }
  0xfd   :  { %v365_v1 = vadd.f32 %v759_v63, %v295_v0 }
 0x117   :  { %v792_v2 = vpop.f32.mrb[2].mxu0 }
 0x118   :  { %v793_v3 = vpop.f32.mrb[3].mxu0 }
 0x119   :  { %v827_v4 = vpop.f32.mrb[2].mxu1  ;;  %v794_v5 = vadd.f32 %v793_v3, %v792_v2 }
 0x11a   :  { %v828_v6 = vpop.f32.mrb[3].mxu1 }
 0x11b   :  { %v829_v7 = vadd.f32 %v828_v6, %v827_v4  ;;  %v435_v8 = vadd.f32 %v794_v5, %v365_v1 }
 0x11d   :  { %v505_v9 = vadd.f32 %v829_v7, %v435_v8 }
 0x137   :  { %v574_v11 = vpop.f32.mrb[4].mxu0 }
 0x138   :  { %v575_v12 = vadd.f32 %v574_v11, %v505_v9  ;;  %v890_v13 = vpop.f32.mrb[5].mxu0 }
 0x13a   :  { %vm578_vm1 = vcmp.gt.f32.partialorder %v575_v12, 0.0  ;;  %v579_v14 = vmul.f32 0.2, %v575_v12 }
 0x13c   :  { %v580_v15 = vsel %vm578_vm1, %v575_v12, %v579_v14 }
 0x13d   :  { %908 = vmatmul.mubr.msk.f32.vlgmr.msra.gmra.mrb[4].mxu1 %vm596_vm2, %v580_v15 }
 0x210   :  { %v666_v17 = vpop.f32.mrb[4].mxu1 }
 0x211   :  { %v667_v18 = vadd.f32 %v688_v16, %v666_v17  ;;  %v909_v19 = vpop.f32.mrb[5].mxu1 }
 0x213   :  { %671 = vst.msk [vmem:[#allocation2] sm:$0x3] %vm670_vm3, %v667_v18 }
 0x214   :  { %1092 = shalt.err (!%p1089_p4)
}
 0x215   :  { %s1093_s8 = scalar_lea.hbm %s1644_s5, 32 }
 0x216   :  { %p1094_p5 = scmp.ne.s32.totalorder %s1644_s5, %s1093_s8  ;;  %p1097_p6 = scmp.lt.u32.totalorder %s1093_s8, %s1644_s5 }
 0x218   :  { %p1099_p7 = pnand %p1097_p6, %p1094_p5 }
 0x21a   :  { %1102 = shalt.err (!%p1099_p7)
}
 0x21b   :  { %681 = dma.vmem_to_hbm [thread:$0]  %s679_s29, 32, %s1644_s5, [#allocation3]  }
 0x21c   :  { %1103 = dma.done.wait [#allocation3], 32  }
 0x21d   :  { %1104 = vsyncadd [#allocation3], 4294967264 }
 0x21e   :  { %685 = vsyncpa [#allocation3], 1 }

</bundles_post_ra>
